<compile_context>
chip_gen: v6e
topology: v6e:2x2x1
jax: 0.10.0
libtpu: 0.0.40
codegen_flags: <defaults>
</compile_context>

<pallas_src>
import math

import jax
import jax.numpy as jnp
from jax.experimental import pallas as pl
from jax.experimental.pallas import tpu as pltpu


def _abs_kernel(x_ref, o_ref):
    # Pure VPU elementwise pass over the VMEM tile.
    o_ref[...] = jnp.abs(x_ref[...])


# Lane width for the general (flattened) path: multiple of 128 -> unmasked vst.
_C_LANE = 1024
# Below this element count, XLA's fused jnp.abs beats the pallas launch cost.
_SMALL_BYPASS_ELEMS = 1 << 15  # 32768 elements


def _chip_tile_params():
    """Return (tile_bytes, vmem_limit_bytes), chip-aware with a safe fallback.

    Default (v7x-safe): 4 MiB tiles, 32 MiB scoped VMEM (v7x has 64 MiB phys).
    v5e/v6e (128 MiB phys VMEM): 8 MiB tiles, 64 MiB scoped VMEM.
    """
    tile_bytes = 4 * 1024 * 1024
    vmem_limit = 32 * 1024 * 1024
    try:
        cap = getattr(pltpu.get_tpu_info(), "vmem_capacity_bytes", None)
        if cap is not None and cap >= 100 * 1024 * 1024:
            tile_bytes = 8 * 1024 * 1024
            vmem_limit = 64 * 1024 * 1024
    except Exception:
        pass  # keep the conservative defaults
    return tile_bytes, vmem_limit


def _run_abs_2d(x2d, tr, vmem_limit, total_elems):
    """Tiled, pipelined |x| over a 2D view with a lane-dense last dim."""
    rows, cols = x2d.shape
    itemsize = x2d.dtype.itemsize
    grid = (pl.cdiv(rows, tr),)  # ragged last block is masked by Pallas
    return pl.pallas_call(
        _abs_kernel,
        out_shape=jax.ShapeDtypeStruct((rows, cols), x2d.dtype),
        grid_spec=pl.GridSpec(
            grid=grid,
            in_specs=[pl.BlockSpec((tr, cols), lambda i: (i, 0))],
            out_specs=pl.BlockSpec((tr, cols), lambda i: (i, 0)),
        ),
        compiler_params=pltpu.CompilerParams(
            # TODO(synk): verify in an xprof trace that the 1-D "parallel" grid
            # lands on both v7x TensorCores; switch to CORE_PARALLEL if not.
            dimension_semantics=("parallel",),
            vmem_limit_bytes=vmem_limit,
        ),
        cost_estimate=pl.CostEstimate(
            flops=total_elems,
            transcendentals=0,
            bytes_accessed=2 * total_elems * itemsize,
        ),
    )(x2d)


def pallas_abs(x: jax.Array, *, force_pallas: bool = False) -> jax.Array:
    """Elementwise absolute value via a tiled, pipelined Pallas TPU kernel.

    Shape- and dtype-preserving for real dtypes (int abs of INT_MIN wraps,
    matching torch/jax two's-complement behavior).
    """
    orig_shape = x.shape
    dtype = x.dtype
    total = math.prod(orig_shape) if orig_shape else 1

    # Unsupported dtypes / degenerate sizes -> plain JAX.
    # (complex abs changes dtype; 64-bit types are not a good fit for the MXU/VPU path)
    if (
        total == 0
        or jnp.issubdtype(dtype, jnp.complexfloating)
        or dtype.itemsize > 4
    ):
        return jnp.abs(x)

    # Small-input bypass: reshape + pallas launch cost dominates tiny tensors.
    if total < _SMALL_BYPASS_ELEMS and not force_pallas:
        return jnp.abs(x)

    itemsize = dtype.itemsize
    sub = max(8, 32 // itemsize)  # sublane multiple: f32->8, bf16->16, int8->32
    tile_bytes, vmem_limit = _chip_tile_params()

    # ---- Fast path: trailing dim already lane-aligned -> no re-tiling copy. ----
    last = orig_shape[-1] if orig_shape else 1
    if last % 128 == 0 and last * itemsize * sub <= tile_bytes:
        rows = total // last
        x2d = x.reshape(rows, last)  # merges only leading dims; minor layout unchanged
        fit = tile_bytes // (last * itemsize)
        tr = min(rows, max(sub, (fit // sub) * sub))
        out2d = _run_abs_2d(x2d, tr, vmem_limit, total)
        return out2d.reshape(orig_shape)

    # ---- General path: lane-dense (rows, 1024) view of the flattened array. ----
    flat = x.reshape(total)
    rows = pl.cdiv(total, _C_LANE)
    pad = rows * _C_LANE - total  # <= 1023 elements; 0 for 1024-multiples
    if pad:
        flat = jnp.pad(flat, (0, pad))
    x2d = flat.reshape(rows, _C_LANE)

    rows_per_tile = max(sub, (tile_bytes // (_C_LANE * itemsize)) // sub * sub)
    tr = min(rows, rows_per_tile)  # full-extent block if rows is small
    out2d = _run_abs_2d(x2d, tr, vmem_limit, total)

    out_flat = out2d.reshape(rows * _C_LANE)
    if pad:
        out_flat = out_flat[:total]
    return out_flat.reshape(orig_shape)


if __name__ == "__main__":
    key = jax.random.PRNGKey(0)
    # Small NCHW tensor consistent with the module: batch=2, channels=4, 16x16.
    x = jax.random.normal(key, (2, 4, 16, 16), dtype=jnp.float32)

    # Exercise the Pallas kernel on the demo input (the small-input bypass
    # would otherwise route this tiny tensor to jnp.abs).
    y = jax.block_until_ready(pallas_abs(x, force_pallas=True))
    assert y.shape == x.shape and y.dtype == x.dtype
    assert jnp.allclose(y, jnp.abs(x)), "mismatch on forced pallas path"

    # Default call (small-input bypass) must agree too.
    assert jnp.allclose(jax.block_until_ready(pallas_abs(x)), jnp.abs(x))

    # Lane-aligned fast path (last dim % 128 == 0): no re-tiling copy, no pad.
    xa = jax.random.normal(jax.random.PRNGKey(1), (512, 256), dtype=jnp.float32)
    ya = jax.block_until_ready(pallas_abs(xa))
    assert jnp.allclose(ya, jnp.abs(xa)), "mismatch on lane-aligned fast path"

    # Ragged general path: multi-step grid with a masked last row-block and a
    # <1024-element tail pad.
    xb = jax.random.normal(jax.random.PRNGKey(2), (3, 700_001), dtype=jnp.float32)
    yb = jax.block_until_ready(pallas_abs(xb))
    assert jnp.allclose(yb, jnp.abs(xb)), "mismatch on ragged tiled path"

    # bf16 path (dtype-aware tile rows / sublane multiple).
    xc = (jax.random.normal(jax.random.PRNGKey(3), (64, 1024)) * 3.0).astype(jnp.bfloat16)
    yc = jax.block_until_ready(pallas_abs(xc))
    assert jnp.allclose(yc.astype(jnp.float32), jnp.abs(xc).astype(jnp.float32))

    print("KERNEL_OK")
</pallas_src>

<mosaic_0001>
module attributes {stable_mosaic.version = 11 : i64} {
  func.func @_abs_kernel(%arg0: i32, %arg1: memref<2x1024xf32, #tpu.memory_space<vmem>>, %arg2: memref<2x1024xf32, #tpu.memory_space<vmem>>) attributes {dimension_semantics = [#tpu.dimension_semantics<parallel>], iteration_bounds = array<i64: 1>, scalar_prefetch = 0 : i64, scratch_operands = 0 : i64, tpu.core_type = #tpu.core_type<tc>, window_params = [{transform_indices = @transform_0, window_bounds = array<i64: 2, 1024>}, {transform_indices = @transform_1, window_bounds = array<i64: 2, 1024>}]} {
    %c0 = arith.constant 0 : index
    %c0_0 = arith.constant 0 : index
    %0 = vector.load %arg1[%c0, %c0_0] : memref<2x1024xf32, #tpu.memory_space<vmem>>, vector<2x1024xf32>
    %1 = math.absf %0 : vector<2x1024xf32>
    %c0_1 = arith.constant 0 : index
    %c0_2 = arith.constant 0 : index
    %2 = vector.load %arg2[%c0_1, %c0_2] : memref<2x1024xf32, #tpu.memory_space<vmem>>, vector<2x1024xf32>
    tpu.vector_store %arg2[%c0_1, %c0_2], %1 {strides = array<i32>} : memref<2x1024xf32, #tpu.memory_space<vmem>>, vector<2x1024xf32>,
    return
  }
  func.func @transform_0(%arg0: i32) -> (i32, i32) {
    %c0_i32 = arith.constant 0 : i32
    %c0_i32_0 = arith.constant 0 : i32
    return %arg0, %c0_i32 : i32, i32
  }
  func.func @transform_1(%arg0: i32) -> (i32, i32) {
    %c0_i32 = arith.constant 0 : i32
    %c0_i32_0 = arith.constant 0 : i32
    return %arg0, %c0_i32 : i32, i32
  }
}

</mosaic_0001>

<bundles_post_ra>
// kernel: tpu_custom_call.1
= control target key start
LH: loop header
LB: loop body
LE: loop exit
PB: predicated region body
PF: predicated region fallthrough
CT: control target
= control target key end

     0   :  { %6 = vsyncpa [#allocation3], 0  ;;  %s106_s0 = inlined_call_operand.hbm [shape: f32[2,1024], index: 0, kind: input, shape index: {}]   ;;  %s107_s1 = inlined_call_operand.hbm [shape: f32[2,1024], index: 1, kind: output, shape index: {}]  }
   0x1   :  { %7 = vsyncpa [#allocation4], 0  ;;  %s88_s6 = smov [#allocation2]  }
   0x2   :  { %s14_s7 = sshll.u32 %s88_s6, 4  ;;  %s15_s7 = int_to_ptr.vmem [resolvable:$true] %s14_s7 }
   0x3   :  { %s52_s8 = scalar_lea.vmem %s15_s7, 256  ;;  %p57_p1 = scmp.lt.s32.totalorder %s15_s7, %s15_s7 }
   0x4   :  { %p53_p0 = scmp.ne.s32.totalorder %s15_s7, %s52_s8  ;;  %p58_p2 = scmp.lt.s32.totalorder %s52_s8, %s52_s8 }
   0x6   :  { %p59_p3 = por %p58_p2, %p57_p1 }
   0x8   :  { %p60_p4 = pnand %p59_p3, %p53_p0 }
   0xa   :  { %63 = shalt.err (!%p60_p4)
}
   0xb   :  { %17 = dma.hbm_to_vmem [thread:$0]  %s106_s0, 256, %s15_s7, [#allocation3]  }
   0xc   :  { %84 = dma.done.wait [#allocation3], 256  }
   0xd   :  { %85 = vsyncadd [#allocation3], 4294967040  ;;  %s89_s11 = smov [#allocation5]   ;;  %v21_v0 = vld [vmem:[#allocation2] sm:$0xff]  ;;  %v22_v1 = vld [vmem:[#allocation2 + $0x8] sm:$0xff] }
   0xe   :  { %s33_s12 = sshll.u32 %s89_s11, 4  ;;  %v23_v2 = vand.u32 2147483647, %v21_v0  ;;  %v24_v3 = vand.u32 2147483647, %v22_v1  ;;  %s34_s12 = int_to_ptr.vmem [resolvable:$true] %s33_s12 }
   0xf   :  { %s64_s13 = scalar_lea.vmem %s34_s12, 256  ;;  %p69_p6 = scmp.lt.s32.totalorder %s34_s12, %s34_s12 }
  0x10   :  { %25 = vst [vmem:[#allocation5] sm:$0xff] %v23_v2  ;;  %26 = vst [vmem:[#allocation5 + $0x8] sm:$0xff] %v24_v3  ;;  %p65_p5 = scmp.ne.s32.totalorder %s34_s12, %s64_s13  ;;  %p70_p7 = scmp.lt.s32.totalorder %s64_s13, %s64_s13 }
  0x12   :  { %p71_p8 = por %p70_p7, %p69_p6 }
  0x14   :  { %p72_p9 = pnand %p71_p8, %p65_p5 }
  0x16   :  { %75 = shalt.err (!%p72_p9)
}
  0x17   :  { %36 = dma.vmem_to_hbm [thread:$0]  %s34_s12, 256, %s107_s1, [#allocation4]  }
  0x18   :  { %86 = dma.done.wait [#allocation4], 256  }
  0x19   :  { %87 = vsyncadd [#allocation4], 4294967040 }
  0x1a   :  { %40 = vsyncpa [#allocation3], 1 }
  0x1b   :  { %41 = vsyncpa [#allocation4], 1 }

</bundles_post_ra>
